<compile_context>
chip_gen: v5e
topology: v5e:2x2
jax: 0.10.0
libtpu: 0.0.40
codegen_flags: <defaults>
</compile_context>

<pallas_src>
import numpy as np
import jax
import jax.numpy as jnp
from jax.experimental import pallas as pl
from jax.experimental.pallas import tpu as pltpu

N_QUBITS = 4
N_LAYERS = 2
DIM = 2 ** N_QUBITS  # 16


# ----------------------------------------------------------------------------
# Host-side glue: build the fixed 16x16 circuit unitary from the weights.
# ----------------------------------------------------------------------------
def _single_qubit_full(g, wire):
    # wire 0 is the most-significant qubit (PennyLane ordering)
    left = jnp.eye(2 ** wire, dtype=jnp.complex64)
    right = jnp.eye(2 ** (N_QUBITS - 1 - wire), dtype=jnp.complex64)
    return jnp.kron(jnp.kron(left, g), right)


def _cnot_full(control, target):
    b = np.arange(DIM)
    cbit = (b >> (N_QUBITS - 1 - control)) & 1
    flipped = b ^ (cbit << (N_QUBITS - 1 - target))
    newb = np.where(cbit == 1, flipped, b)
    m = np.zeros((DIM, DIM), dtype=np.complex64)
    m[newb, b] = 1.0
    return jnp.asarray(m)


def _rx(theta):
    c = jnp.cos(theta / 2).astype(jnp.complex64)
    s = jnp.sin(theta / 2).astype(jnp.complex64)
    return jnp.stack([jnp.stack([c, -1j * s]), jnp.stack([-1j * s, c])])


def _ry(theta):
    c = jnp.cos(theta / 2).astype(jnp.complex64)
    s = jnp.sin(theta / 2).astype(jnp.complex64)
    return jnp.stack([jnp.stack([c, -s]), jnp.stack([s, c])])


def _rz(theta):
    em = jnp.exp(-1j * theta.astype(jnp.complex64) / 2)
    ep = jnp.exp(1j * theta.astype(jnp.complex64) / 2)
    z = jnp.zeros((), jnp.complex64)
    return jnp.stack([jnp.stack([em, z]), jnp.stack([z, ep])])


def build_circuit_unitary(weights):
    """Unitary of everything after the AngleEmbedding (all CNOTs + rotations)."""
    u = jnp.eye(DIM, dtype=jnp.complex64)
    for layer in range(N_LAYERS):
        for (c, t) in [(0, 1), (1, 2), (2, 3), (3, 0)]:
            u = _cnot_full(c, t) @ u
        for i in range(N_QUBITS):
            u = _single_qubit_full(_rx(weights[layer, i, 0]), i) @ u
            u = _single_qubit_full(_ry(weights[layer, i, 1]), i) @ u
            u = _single_qubit_full(_rz(weights[layer, i, 2]), i) @ u
    return u


def _constant_tables(u):
    """bits (16,4) f32, V_packed = [Re(U*phase); Im(U*phase)] (32,16),
    Z2^T = [Z^T | Z^T] (4,32) so out = Z2^T @ (psi*psi)."""
    b = np.arange(DIM)
    bits = np.stack([(b >> (N_QUBITS - 1 - i)) & 1
                     for i in range(N_QUBITS)], axis=1)            # (16, 4)
    popcnt = bits.sum(axis=1)
    phase = (-1j) ** popcnt                                        # (16,)
    zsign_t = (1.0 - 2.0 * bits.T).astype(np.float32)              # (4, 16)
    z2t = np.concatenate([zsign_t, zsign_t], axis=1)               # (4, 32)
    # Fold the embedding phase into the unitary columns: V[j,k] = U[j,k]*phase[k]
    v = u * jnp.asarray(phase, jnp.complex64)[None, :]
    v_packed = jnp.concatenate(
        [jnp.real(v), jnp.imag(v)], axis=0).astype(jnp.float32)    # (32, 16)
    return (jnp.asarray(bits.astype(np.float32)),                  # (16, 4)
            v_packed,                                              # (32, 16)
            jnp.asarray(z2t))                                      # (4, 32)


def _round_up(n, m):
    return ((n + m - 1) // m) * m


# ----------------------------------------------------------------------------
# Pallas kernel (batch on the 128-lane axis):
#   x (4, TB) -> mag (16, TB) -> psi = [V_re; V_im] @ mag (32, TB)
#   -> out = Z2^T @ (psi * psi) (4, TB)
# ----------------------------------------------------------------------------
def quantum_kernel(x_ref, bits_ref, v_ref, z2t_ref, out_ref):
    x = x_ref[...]                          # (4, TB) angles, batch on lanes
    c = jnp.cos(0.5 * x)                    # (4, TB)  EUP
    s = jnp.sin(0.5 * x)
    d = s - c                               # (4, TB)

    # Magnitudes of the AngleEmbedding product state (phase folded into V):
    #   mag[k, b] = prod_i (c[i,b] + bit_i(k) * (s[i,b] - c[i,b]))
    tb = x.shape[1]
    mag = jnp.ones((DIM, tb), jnp.float32)  # (16, TB)
    for i in range(N_QUBITS):               # static, unrolled (4 iters)
        bi = bits_ref[:, i:i + 1]           # (16, 1)
        mag = mag * (c[i:i + 1, :] + bi * d[i:i + 1, :])

    # Single fused real matmul: [psi_re; psi_im] = [V_re; V_im] @ mag
    psi = jnp.dot(v_ref[...], mag, preferred_element_type=jnp.float32)  # (32, TB)

    # Pauli-Z expectations: out = [Z^T | Z^T] @ (psi_re^2 ; psi_im^2)
    out_ref[...] = jnp.dot(z2t_ref[...], psi * psi,
                           preferred_element_type=jnp.float32)          # (4, TB)


def quantum_layer_forward(x, weights, *, tile_b=None):
    """x: (B, n_qubits) float32 -> (B, n_qubits) Pauli-Z expectation values."""
    b = x.shape[0]
    u = build_circuit_unitary(weights)
    bits, v_packed, z2t = _constant_tables(u)

    # Batch tile on the lane axis: multiple of 128, capped (VMEM per step stays
    # tiny: ~4*TB*4 B in + out, double-buffered -> safe on v7x 64 MiB).
    if tile_b is None:
        tile_b = min(4096, _round_up(max(b, 1), 128))
    b_pad = _round_up(max(b, 1), tile_b)

    # Transpose to (qubits, batch) and zero-pad the batch remainder
    # (cos(0)=1, sin(0)=0 -> padding columns are benign).
    xt = jnp.pad(x.astype(jnp.float32).T, ((0, 0), (0, b_pad - b)))

    out_t = pl.pallas_call(
        quantum_kernel,
        out_shape=jax.ShapeDtypeStruct((N_QUBITS, b_pad), jnp.float32),
        grid=(b_pad // tile_b,),
        in_specs=[
            pl.BlockSpec((N_QUBITS, tile_b), lambda i: (0, i)),   # x tile
            pl.BlockSpec((DIM, N_QUBITS), lambda i: (0, 0)),      # bits (resident)
            pl.BlockSpec((2 * DIM, DIM), lambda i: (0, 0)),       # [V_re; V_im]
            pl.BlockSpec((N_QUBITS, 2 * DIM), lambda i: (0, 0)),  # [Z^T | Z^T]
        ],
        out_specs=pl.BlockSpec((N_QUBITS, tile_b), lambda i: (0, i)),
        compiler_params=pltpu.CompilerParams(
            dimension_semantics=("parallel",)),
    )(xt, bits, v_packed, z2t)

    return out_t[:, :b].T                                         # (B, n_qubits)


# ----------------------------------------------------------------------------
# Pure-JAX reference (complex statevector) for a sanity check.
# ----------------------------------------------------------------------------
def reference_forward(x, weights):
    u = build_circuit_unitary(weights)
    bits = np.stack([(np.arange(DIM) >> (N_QUBITS - 1 - i)) & 1
                     for i in range(N_QUBITS)], axis=1)          # (16, 4)
    amps = []
    for bvec in bits:
        a = jnp.ones((x.shape[0],), jnp.complex64)
        for i in range(N_QUBITS):
            ci = jnp.cos(x[:, i] / 2).astype(jnp.complex64)
            si = (-1j * jnp.sin(x[:, i] / 2)).astype(jnp.complex64)
            a = a * (si if bvec[i] else ci)
        amps.append(a)
    psi0 = jnp.stack(amps, axis=1)                               # (B, 16)
    psi = psi0 @ u.T                                             # (B, 16)
    prob = jnp.abs(psi) ** 2
    zsign = jnp.asarray((1.0 - 2.0 * bits).astype(np.float32))   # (16, 4)
    return (prob @ zsign).astype(jnp.float32)


if __name__ == "__main__":
    key = jax.random.PRNGKey(0)
    kx, kw = jax.random.split(key)
    batch = 8
    x = jax.random.normal(kx, (batch, N_QUBITS), dtype=jnp.float32)
    weights = jax.random.normal(kw, (N_LAYERS, N_QUBITS, 3), dtype=jnp.float32)
    # TODO(synk): self.bias / self.class_bias are unused by the torch forward
    # pass (never referenced inside quantum_model), so they are omitted here.

    out = jax.block_until_ready(quantum_layer_forward(x, weights))
    ref = jax.block_until_ready(reference_forward(x, weights))
    np.testing.assert_allclose(np.asarray(out), np.asarray(ref),
                               atol=1e-4, rtol=1e-4)
    assert out.shape == (batch, N_QUBITS)
    print("KERNEL_OK")
</pallas_src>

<mosaic_0001>
module attributes {stable_mosaic.version = 11 : i64} {
  func.func @quantum_kernel(%arg0: i32, %arg1: memref<4x128xf32, #tpu.memory_space<vmem>>, %arg2: memref<16x4xf32, #tpu.memory_space<vmem>>, %arg3: memref<32x16xf32, #tpu.memory_space<vmem>>, %arg4: memref<4x32xf32, #tpu.memory_space<vmem>>, %arg5: memref<4x128xf32, #tpu.memory_space<vmem>>) attributes {dimension_semantics = [#tpu.dimension_semantics<parallel>], iteration_bounds = array<i64: 1>, scalar_prefetch = 0 : i64, scratch_operands = 0 : i64, tpu.core_type = #tpu.core_type<tc>, window_params = [{transform_indices = @transform_0, window_bounds = array<i64: 4, 128>}, {pipeline_mode = #tpu.pipeline_mode<synchronous>, transform_indices = @transform_1, window_bounds = array<i64: 16, 4>}, {pipeline_mode = #tpu.pipeline_mode<synchronous>, transform_indices = @transform_2, window_bounds = array<i64: 32, 16>}, {pipeline_mode = #tpu.pipeline_mode<synchronous>, transform_indices = @transform_3, window_bounds = array<i64: 4, 32>}, {transform_indices = @transform_4, window_bounds = array<i64: 4, 128>}]} {
    %c0 = arith.constant 0 : index
    %c0_0 = arith.constant 0 : index
    %0 = vector.load %arg1[%c0, %c0_0] : memref<4x128xf32, #tpu.memory_space<vmem>>, vector<4x128xf32>
    %cst = arith.constant 5.000000e-01 : f32
    %1 = vector.broadcast %cst : f32 to vector<4x128xf32>
    %2 = arith.mulf %1, %0 : vector<4x128xf32>
    %3 = math.cos %2 : vector<4x128xf32>
    %cst_1 = arith.constant 5.000000e-01 : f32
    %4 = vector.broadcast %cst_1 : f32 to vector<4x128xf32>
    %5 = arith.mulf %4, %0 : vector<4x128xf32>
    %6 = math.sin %5 : vector<4x128xf32>
    %7 = arith.subf %6, %3 : vector<4x128xf32>
    %cst_2 = arith.constant 1.000000e+00 : f32
    %8 = vector.broadcast %cst_2 : f32 to vector<16x128xf32>
    %c0_3 = arith.constant 0 : index
    %c0_4 = arith.constant 0 : index
    %9 = vector.load %arg2[%c0_3, %c0_4] : memref<16x4xf32, #tpu.memory_space<vmem>>, vector<16x1xf32>
    %10 = vector.extract_strided_slice %3 {offsets = [0, 0], sizes = [1, 128], strides = [1, 1]} : vector<4x128xf32> to vector<1x128xf32>
    %11 = vector.extract_strided_slice %7 {offsets = [0, 0], sizes = [1, 128], strides = [1, 1]} : vector<4x128xf32> to vector<1x128xf32>
    %12 = vector.broadcast %9 : vector<16x1xf32> to vector<16x128xf32>
    %13 = vector.broadcast %11 : vector<1x128xf32> to vector<16x128xf32>
    %14 = arith.mulf %12, %13 : vector<16x128xf32>
    %15 = vector.broadcast %10 : vector<1x128xf32> to vector<16x128xf32>
    %16 = arith.addf %15, %14 : vector<16x128xf32>
    %17 = arith.mulf %8, %16 : vector<16x128xf32>
    %c0_5 = arith.constant 0 : index
    %c1 = arith.constant 1 : index
    %18 = vector.load %arg2[%c0_5, %c1] : memref<16x4xf32, #tpu.memory_space<vmem>>, vector<16x1xf32>
    %19 = vector.extract_strided_slice %3 {offsets = [1, 0], sizes = [1, 128], strides = [1, 1]} : vector<4x128xf32> to vector<1x128xf32>
    %20 = vector.extract_strided_slice %7 {offsets = [1, 0], sizes = [1, 128], strides = [1, 1]} : vector<4x128xf32> to vector<1x128xf32>
    %21 = vector.broadcast %18 : vector<16x1xf32> to vector<16x128xf32>
    %22 = vector.broadcast %20 : vector<1x128xf32> to vector<16x128xf32>
    %23 = arith.mulf %21, %22 : vector<16x128xf32>
    %24 = vector.broadcast %19 : vector<1x128xf32> to vector<16x128xf32>
    %25 = arith.addf %24, %23 : vector<16x128xf32>
    %26 = arith.mulf %17, %25 : vector<16x128xf32>
    %c0_6 = arith.constant 0 : index
    %c2 = arith.constant 2 : index
    %27 = vector.load %arg2[%c0_6, %c2] : memref<16x4xf32, #tpu.memory_space<vmem>>, vector<16x1xf32>
    %28 = vector.extract_strided_slice %3 {offsets = [2, 0], sizes = [1, 128], strides = [1, 1]} : vector<4x128xf32> to vector<1x128xf32>
    %29 = vector.extract_strided_slice %7 {offsets = [2, 0], sizes = [1, 128], strides = [1, 1]} : vector<4x128xf32> to vector<1x128xf32>
    %30 = vector.broadcast %27 : vector<16x1xf32> to vector<16x128xf32>
    %31 = vector.broadcast %29 : vector<1x128xf32> to vector<16x128xf32>
    %32 = arith.mulf %30, %31 : vector<16x128xf32>
    %33 = vector.broadcast %28 : vector<1x128xf32> to vector<16x128xf32>
    %34 = arith.addf %33, %32 : vector<16x128xf32>
    %35 = arith.mulf %26, %34 : vector<16x128xf32>
    %c0_7 = arith.constant 0 : index
    %c3 = arith.constant 3 : index
    %36 = vector.load %arg2[%c0_7, %c3] : memref<16x4xf32, #tpu.memory_space<vmem>>, vector<16x1xf32>
    %37 = vector.extract_strided_slice %3 {offsets = [3, 0], sizes = [1, 128], strides = [1, 1]} : vector<4x128xf32> to vector<1x128xf32>
    %38 = vector.extract_strided_slice %7 {offsets = [3, 0], sizes = [1, 128], strides = [1, 1]} : vector<4x128xf32> to vector<1x128xf32>
    %39 = vector.broadcast %36 : vector<16x1xf32> to vector<16x128xf32>
    %40 = vector.broadcast %38 : vector<1x128xf32> to vector<16x128xf32>
    %41 = arith.mulf %39, %40 : vector<16x128xf32>
    %42 = vector.broadcast %37 : vector<1x128xf32> to vector<16x128xf32>
    %43 = arith.addf %42, %41 : vector<16x128xf32>
    %44 = arith.mulf %35, %43 : vector<16x128xf32>
    %c0_8 = arith.constant 0 : index
    %c0_9 = arith.constant 0 : index
    %45 = vector.load %arg3[%c0_8, %c0_9] : memref<32x16xf32, #tpu.memory_space<vmem>>, vector<32x16xf32>
    %cst_10 = arith.constant dense<0.000000e+00> : vector<32x128xf32>
    %46 = tpu.matmul %45, %44, %cst_10 {dimension_numbers = #tpu.dot_dimension_numbers<[1], [0], [0], [1], [0, 0, 1, 1], [], []>} : vector<32x16xf32>, vector<16x128xf32>, vector<32x128xf32> -> vector<32x128xf32>
    %c0_11 = arith.constant 0 : index
    %c0_12 = arith.constant 0 : index
    %47 = vector.load %arg4[%c0_11, %c0_12] : memref<4x32xf32, #tpu.memory_space<vmem>>, vector<4x32xf32>
    %48 = arith.mulf %46, %46 : vector<32x128xf32>
    %cst_13 = arith.constant dense<0.000000e+00> : vector<4x128xf32>
    %49 = tpu.matmul %47, %48, %cst_13 {dimension_numbers = #tpu.dot_dimension_numbers<[1], [0], [0], [1], [0, 0, 1, 1], [], []>} : vector<4x32xf32>, vector<32x128xf32>, vector<4x128xf32> -> vector<4x128xf32>
    %c0_14 = arith.constant 0 : index
    %c0_15 = arith.constant 0 : index
    %50 = vector.load %arg5[%c0_14, %c0_15] : memref<4x128xf32, #tpu.memory_space<vmem>>, vector<4x128xf32>
    tpu.vector_store %arg5[%c0_14, %c0_15], %49 {strides = array<i32>} : memref<4x128xf32, #tpu.memory_space<vmem>>, vector<4x128xf32>,
    return
  }
  func.func @transform_0(%arg0: i32) -> (i32, i32) {
    %c0_i32 = arith.constant 0 : i32
    %c0_i32_0 = arith.constant 0 : i32
    return %c0_i32, %arg0 : i32, i32
  }
  func.func @transform_1(%arg0: i32) -> (i32, i32) {
    %c0_i32 = arith.constant 0 : i32
    %c0_i32_0 = arith.constant 0 : i32
    %c0_i32_1 = arith.constant 0 : i32
    return %c0_i32, %c0_i32_0 : i32, i32
  }
  func.func @transform_2(%arg0: i32) -> (i32, i32) {
    %c0_i32 = arith.constant 0 : i32
    %c0_i32_0 = arith.constant 0 : i32
    %c0_i32_1 = arith.constant 0 : i32
    return %c0_i32, %c0_i32_0 : i32, i32
  }
  func.func @transform_3(%arg0: i32) -> (i32, i32) {
    %c0_i32 = arith.constant 0 : i32
    %c0_i32_0 = arith.constant 0 : i32
    %c0_i32_1 = arith.constant 0 : i32
    return %c0_i32, %c0_i32_0 : i32, i32
  }
  func.func @transform_4(%arg0: i32) -> (i32, i32) {
    %c0_i32 = arith.constant 0 : i32
    %c0_i32_0 = arith.constant 0 : i32
    return %c0_i32, %arg0 : i32, i32
  }
}

</mosaic_0001>

<bundles_post_ra>
// kernel: tpu_custom_call.1
= control target key start
LH: loop header
LB: loop body
LE: loop exit
PB: predicated region body
PF: predicated region fallthrough
CT: control target
= control target key end

     0   :  { %v548_v2 = vmov 0   ;;  %s677_s0 = inlined_call_operand.vmem [shape: f32[4,128], index: 0, kind: input, shape index: {}]   ;;  %s678_s1 = inlined_call_operand.vmem [shape: f32[16,4], index: 1, kind: input, shape index: {}]   ;;  %s679_s2 = inlined_call_operand.vmem [shape: f32[32,16], index: 2, kind: input, shape index: {}]   ;;  %s680_s3 = inlined_call_operand.vmem [shape: f32[4,32], index: 3, kind: input, shape index: {}]   ;;  %s681_s4 = inlined_call_operand.hbm [shape: f32[4,128], index: 4, kind: output, shape index: {}]  }
   0x1   :  { %v18_v0 = vld [vmem:[%s677_s0] sm:$0xf]  ;;  %516 = vset.pattern.permute.xlu1 %v548_v2  ;;  %514 = vset.pattern.permute.xlu0 %v548_v2  ;;  %v331_v4 = vld [vmem:[%s678_s1 + $0x8] sm:$0xff] }
   0x2   :  { %v590_v1 = vld [vmem:[%s678_s1] sm:$0xff]  ;;  %v593_v3 = vmul.f32 0.5, %v18_v0  ;;  %339 = vperm.xlu0 %514, %v331_v4  }
   0x3   :  { %334 = vperm.xlu1 %516, %v590_v1  }
   0x4   :  { %v23_v5 = vand.u32 2139095040, %v593_v3 }
   0x5   :  { %9 = vsyncpa [#allocation3], 0  ;;  %v549_v7 = vmov 2   ;;  %v20_v8 = vand.u32 2147483647, %v593_v3  ;;  %v550_v12 = vmov 1  }
   0x6   :  { %v24_v6 = vshrl.u32 %v23_v5, 23  ;;  %518 = vset.pattern.permute.xlu2 %v549_v7  ;;  %v551_v18 = vmov 683565275   ;;  %v552_v20 = vmov 2475754826   ;;  %v557_v38 = vmov 3  }
   0x7   :  { %369 = vperm.xlu2 %518, %v331_v4   ;;  %v27_v11 = vand.u32 8388607, %v20_v8  ;;  %v553_v22 = vmov 2131351028   ;;  %v554_v24 = vmov 2102212464  }
   0x8   :  { %v488_v9 = vadd.s32 4294967169, %v24_v6  ;;  %v555_v26 = vmov 920167782   ;;  %v556_v32 = vmov 1326507024   ;;  %vm22_vm12 = vcmp.lt.s32.totalorder %v593_v3, 0 }
   0x9   :  { %v28_v15 = vor.u32 8388608, %v27_v11  ;;  %vm649_vm13 = vcmp.le.f32.partialorder %v20_v8, 0.7853982  ;;  %s479_s6 = sshll.u32 %s681_s4, 4  ;;  %s480_s6 = int_to_ptr.hbm [resolvable:$true] %s479_s6 }
   0xa   :  { %v30_v10 = vadd.s32 1, %v488_v9  ;;  %515 = vset.pattern.permute.xlu0 %v550_v12 }
   0xb   :  { %517 = vset.pattern.permute.xlu1 %v550_v12  ;;  %353 = vperm.xlu0 %515, %v331_v4   ;;  %v609_v34 = vshll.u32 %v28_v15, 8 }
   0xc   :  { %vm31_vm0 = vcmp.gt.s32.totalorder %v30_v10, 0  ;;  %349 = vperm.xlu1 %517, %v590_v1  }
   0xd   :  { %v32_v13 = vsel %vm31_vm0, %v30_v10, 0  ;;  %v69_v47 = vand.u32 65535, %v609_v34  ;;  %v70_v48 = vshrl.u32 %v609_v34, 16 }
   0xe   :  { %v34_v14 = vand.u32 31, %v32_v13  ;;  %v605_v16 = vshrl.u32 %v32_v13, 5 }
   0xf   :  { %365 = vperm.xlu2 %518, %v590_v1  }
  0x10   :  { %v35_v17 = vsub.s32 32, %v34_v14  ;;  %v37_v19 = vshll.u32 %v551_v18, %v34_v14  ;;  %v40_v21 = vshll.u32 %v552_v20, %v34_v14  ;;  %v43_v23 = vshll.u32 %v553_v22, %v34_v14 }
  0x11   :  { %v46_v25 = vshll.u32 %v554_v24, %v34_v14  ;;  %v49_v27 = vshll.u32 %v555_v26, %v34_v14  ;;  %vm52_vm1 = vcmp.lt.s32.totalorder %v605_v16, 1  ;;  %vm55_vm2 = vcmp.lt.s32.totalorder %v605_v16, 4 }
  0x12   :  { %v38_v28 = vshrl.u32 %v552_v20, %v35_v17  ;;  %v41_v29 = vshrl.u32 %v553_v22, %v35_v17  ;;  %v44_v30 = vshrl.u32 %v554_v24, %v35_v17  ;;  %v47_v31 = vshrl.u32 %v555_v26, %v35_v17 }
  0x13   :  { %v50_v33 = vshrl.u32 %v556_v32, %v35_v17  ;;  %521 = vset.pattern.permute.xlu0 %v557_v38  ;;  %vm54_vm3 = vcmp.lt.s32.totalorder %v605_v16, 3  ;;  %vm53_vm4 = vcmp.lt.s32.totalorder %v605_v16, 2  ;;  %v36_v55 = vshrl.u32 %v551_v18, %v35_v17 }
  0x14   :  { %v39_v35 = vor.u32 %v38_v28, %v37_v19  ;;  %v42_v36 = vor.u32 %v41_v29, %v40_v21  ;;  %v45_v37 = vor.u32 %v44_v30, %v43_v23  ;;  %519 = vset.pattern.permute.xlu1 %v557_v38  ;;  %v48_v39 = vor.u32 %v47_v31, %v46_v25 }
  0x15   :  { %v51_v40 = vor.u32 %v50_v33, %v49_v27  ;;  %385 = vperm.xlu1 %519, %v331_v4  }
  0x16   :  { %v60_v41 = vsel %vm52_vm1, %v39_v35, %v42_v36  ;;  %v64_v42 = vsel %vm52_vm1, %v42_v36, %v45_v37  ;;  %v61_v43 = vsel %vm55_vm2, %v48_v39, 920167782  ;;  %v56_v6 = vsel %vm52_vm1, %v36_v55, %v39_v35 }
  0x17   :  { %v65_v44 = vsel %vm55_vm2, %v51_v40, 1326507024  ;;  %520 = vset.pattern.permute.xlu2 %v557_v38  ;;  %v62_v45 = vsel %vm54_vm3, %v45_v37, %v61_v43  ;;  %v57_v9 = vsel %vm55_vm2, %v45_v37, 2102212464 }
  0x18   :  { %v66_v46 = vsel %vm54_vm3, %v48_v39, %v65_v44  ;;  %381 = vperm.xlu2 %520, %v590_v1   ;;  %v63_v49 = vsel %vm53_vm4, %v60_v41, %v62_v45  ;;  %v58_v19 = vsel %vm54_vm3, %v42_v36, %v57_v9 }
  0x19   :  { %v67_v50 = vsel %vm53_vm4, %v64_v42, %v66_v46  ;;  %v93_v53 = vand.u32 65535, %v63_v49  ;;  %v94_v54 = vshrl.u32 %v63_v49, 16  ;;  %v59_v27 = vsel %vm53_vm4, %v56_v6, %v58_v19 }
  0x1a   :  { %v71_v51 = vand.u32 65535, %v67_v50  ;;  %v72_v52 = vshrl.u32 %v67_v50, 16  ;;  %v113_v31 = vmul.u32 %v609_v34, %v59_v27  ;;  %vm163_vm4 = vweird.f32 %v593_v3 }
  0x1b   :  { %v95_v59 = vmul.u32 %v93_v53, %v69_v47  ;;  %v96_v60 = vmul.u32 %v94_v54, %v69_v47  ;;  %v97_v61 = vmul.u32 %v93_v53, %v70_v48  ;;  %v98_v1 = vmul.u32 %v94_v54, %v70_v48 }
  0x1c   :  { %v73_v56 = vmul.u32 %v71_v51, %v69_v47  ;;  %v74_v57 = vmul.u32 %v72_v52, %v69_v47  ;;  %v75_v58 = vmul.u32 %v71_v51, %v70_v48  ;;  %v76_v62 = vmul.u32 %v72_v52, %v70_v48 }
  0x1d   :  { %v99_v4 = vshll.u32 %v96_v60, 16  ;;  %v101_v5 = vshll.u32 %v97_v61, 16  ;;  %v100_v17 = vshrl.u32 %v96_v60, 16  ;;  %v102_v23 = vshrl.u32 %v97_v61, 16 }
  0x1e   :  { %v77_v63 = vshll.u32 %v74_v57, 16  ;;  %v79_v0 = vshll.u32 %v75_v58, 16  ;;  %v78_v12 = vshrl.u32 %v74_v57, 16  ;;  %v80_v20 = vshrl.u32 %v75_v58, 16 }
  0x1f   :  { %vm103_vm6 = vc.u32 %v95_v59, %v99_v4  ;;  %v105_v11 = vadd.s32 %v99_v4, %v95_v59 }
  0x20   :  { %vm81_vm5 = vc.u32 %v73_v56, %v77_v63  ;;  %v83_v7 = vadd.s32 %v77_v63, %v73_v56  ;;  %v104_v14 = vsel %vm103_vm6, 1, %v548_v2  ;;  %vm447_vm6 = vcmask 261120  }
  0x21   :  { %v82_v10 = vsel %vm81_vm5, 1, %v548_v2  ;;  %v106_v18 = vadd.s32 %v104_v14, %v98_v1  ;;  %vm107_vm8 = vc.u32 %v105_v11, %v101_v5  ;;  %v109_v26 = vadd.s32 %v105_v11, %v101_v5 }
  0x22   :  { %v84_v13 = vadd.s32 %v82_v10, %v76_v62  ;;  %vm85_vm7 = vc.u32 %v83_v7, %v79_v0  ;;  %v108_v22 = vsel %vm107_vm8, 1, %v548_v2  ;;  %vm400_vm5 = vcmask 130048  }
  0x23   :  { %v86_v15 = vsel %vm85_vm7, 1, %v548_v2  ;;  %v110_v24 = vadd.s32 %v108_v22, %v106_v18 }
  0x24   :  { %v88_v21 = vadd.s32 %v86_v15, %v84_v13 }
  0x25   :  { %v111_v28 = vadd.s32 %v110_v24, %v100_v17 }
  0x26   :  { %v89_v25 = vadd.s32 %v88_v21, %v78_v12 }
  0x27   :  { %v112_v30 = vadd.s32 %v111_v28, %v102_v23 }
  0x28   :  { %v90_v29 = vadd.s32 %v89_v25, %v80_v20 }
  0x29   :  { %v116_v32 = vadd.s32 1, %v112_v30 }
  0x2a   :  { %vm115_vm9 = vc.u32 %v90_v29, %v109_v26  ;;  %v114_v16 = vadd.s32 %v109_v26, %v90_v29 }
  0x2b   :  { %v117_v33 = vsel %vm115_vm9, %v116_v32, %v112_v30 }
  0x2c   :  { %v118_v35 = vadd.s32 %v117_v33, %v113_v31 }
  0x2e   :  { %v119_v36 = vadd.s32 536870912, %v118_v35 }
  0x30   :  { %v120_v37 = vshrl.u32 %v119_v36, 30 }
  0x32   :  { %v121_v38 = vshll.u32 %v120_v37, 30  ;;  %v144_v0 = vsub.s32 4, %v120_v37 }
  0x34   :  { %v122_v2 = vsub.s32 %v118_v35, %v121_v38  ;;  %v145_v5 = vsel %vm22_vm12, %v144_v0, %v120_v37  ;;  %v399_v0 = vld [vmem:[%s679_s2 + $0x18] sm:$0xff] }
  0x35   :  { %v147_v7 = vsel %vm649_vm13, 0, %v145_v5 }
  0x36   :  { %vm123_vm10 = vcmp.lt.s32.totalorder %v122_v2, 0  ;;  %v124_v39 = vsub.s32 0, %v122_v2  ;;  %v318_v11 = vadd.s32 3, %v147_v7  ;;  %v164_v14 = vand.u32 3, %v147_v7 }
  0x38   :  { %v125_v40 = vsel %vm123_vm10, %v124_v39, %v122_v2  ;;  %v319_v15 = vand.u32 3, %v318_v11  ;;  %vm166_vm14 = vcmp.eq.s32.totalorder %v164_v14, 0  ;;  %vm169_vm15 = vcmp.eq.s32.totalorder %v164_v14, 2 }
  0x39   :  { %v126_v41 = vclz %v125_v40  ;;  %vm165_vm2 = vcmp.lt.s32.totalorder %v164_v14, 2 }
  0x3a   :  { %vm321_vm0 = vcmp.eq.s32.totalorder %v319_v15, 0  ;;  %vm324_vm1 = vcmp.eq.s32.totalorder %v319_v15, 2  ;;  %vm320_vm3 = vcmp.lt.s32.totalorder %v319_v15, 2 }
  0x3b   :  { %v489_v42 = vadd.s32 4294967294, %v126_v41 }
  0x3d   :  { %vm490_vm11 = vcmp.lt.s32.totalorder %v489_v42, 0 }
  0x3e   :  { %v129_v43 = vsel %vm490_vm11, 0, %v489_v42 }
  0x3f   :  { %v130_v44 = vsub.s32 32, %v129_v43  ;;  %v131_v45 = vshll.u32 %v122_v2, %v129_v43  ;;  %v134_v46 = vsub.s32 4294967266, %v129_v43 }
  0x41   :  { %v132_v34 = vshrl.u32 %v114_v16, %v130_v44  ;;  %v135_v47 = vadd.s32 127, %v134_v46 }
  0x43   :  { %v133_v48 = vor.u32 %v132_v34, %v131_v45  ;;  %v136_v49 = vshll.u32 %v135_v47, 23 }
  0x45   :  { %v137_v50 = vor.u32 4788187, %v136_v49  ;;  %v140_v51 = vcvt.s32.f32 %v133_v48 }
  0x47   :  { %v138_v52 = vand.u32 2147483647, %v137_v50 }
  0x49   :  { %v141_v53 = vmul.f32 %v140_v51, %v138_v52 }
  0x4b   :  { %v142_v55 = vxor.u32 2147483648, %v141_v53 }
  0x4d   :  { %v143_v56 = vsel %vm22_vm12, %v142_v55, %v141_v53 }
  0x4e   :  { %v146_v57 = vsel %vm649_vm13, %v593_v3, %v143_v56 }
  0x4f   :  { %v148_v58 = vmul.f32 %v146_v57, %v146_v57 }
  0x51   :  { %v149_v59 = vmul.f32 -0.001358992, %v148_v58  ;;  %v156_v60 = vmul.f32 -0.00019511016, %v148_v58 }
  0x53   :  { %v157_v61 = vadd.f32 0.008332121, %v156_v60  ;;  %v150_v62 = vadd.f32 0.041655596, %v149_v59 }
  0x55   :  { %v158_v63 = vmul.f32 %v157_v61, %v148_v58  ;;  %v151_v1 = vmul.f32 %v150_v62, %v148_v58 }
  0x57   :  { %v159_v4 = vadd.f32 -0.16666654, %v158_v63  ;;  %v152_v8 = vadd.f32 -0.4999988, %v151_v1  ;;  %v397_v63 = vld [vmem:[%s679_s2 + $0x8] sm:$0xff]  ;;  %v396_v1 = vld [vmem:[%s679_s2] sm:$0xff] }
  0x59   :  { %v160_v6 = vmul.f32 %v159_v4, %v148_v58  ;;  %v153_v9 = vmul.f32 %v152_v8, %v148_v58  ;;  %v398_v4 = vld [vmem:[%s679_s2 + $0x10] sm:$0xff]  ;;  %s558_s2 = smov [#allocation2]  }
  0x5a   :  { %s477_s29 = sshll.u32 %s558_s2, 4  ;;  %s478_s29 = int_to_ptr.vmem [resolvable:$true] %s477_s29 }
  0x5b   :  { %v161_v10 = vadd.f32 1.0, %v160_v6  ;;  %v154_v12 = vadd.f32 1.0, %v153_v9 }
  0x5d   :  { %v162_v13 = vmul.f32 %v161_v10, %v146_v57  ;;  %v170_v18 = vxor.u32 2147483648, %v154_v12 }
  0x5f   :  { %v167_v17 = vxor.u32 2147483648, %v162_v13  ;;  %v171_v20 = vsel %vm169_vm15, %v170_v18, %v162_v13  ;;  %v326_v22 = vsel %vm324_vm1, %v170_v18, %v162_v13  ;;  %v442_v13 = vld [vmem:[%s680_s3] sm:$0xf] }
  0x61   :  { %v168_v19 = vsel %vm166_vm14, %v154_v12, %v167_v17  ;;  %v323_v21 = vsel %vm321_vm0, %v154_v12, %v167_v17  ;;  %v370_v23 = vpop.permute.xlu2 %369 }
  0x62   :  { %v172_v24 = vsel %vm165_vm2, %v168_v19, %v171_v20  ;;  %v327_v25 = vsel %vm320_vm3, %v323_v21, %v326_v22 }
  0x63   :  { %v173_v26 = vsel %vm163_vm4, nan, %v172_v24  ;;  %v328_v27 = vsel %vm163_vm4, nan, %v327_v25 }
  0x64   :  { %v329_v30 = vsub.f32 %v328_v27, %v173_v26  ;;  %v359_v36 = vperm.slane %v173_v26, 1  ;;  %v345_v41 = vperm.slane %v173_v26, 0  ;;  %v375_v44 = vperm.slane %v173_v26, 2 }
  0x65   :  { %v391_v52 = vperm.slane %v173_v26, 3 }
  0x66   :  { %v356_v32 = vperm.slane %v329_v30, 1  ;;  %v342_v33 = vperm.slane %v329_v30, 0  ;;  %v372_v39 = vperm.slane %v329_v30, 2  ;;  %v388_v43 = vperm.slane %v329_v30, 3 }
  0x68   :  { %v374_v46 = vmul.f32 %v372_v39, %v370_v23 }
  0x69   :  { %v366_v31 = vpop.permute.xlu2 %365 }
  0x6a   :  { %v373_v48 = vmul.f32 %v372_v39, %v366_v31  ;;  %v377_v54 = vadd.f32 %v375_v44, %v374_v46 }
  0x6c   :  { %v376_v55 = vadd.f32 %v375_v44, %v373_v48 }
  0x72   :  { %v382_v45 = vpop.permute.xlu2 %381 }
  0x73   :  { %v389_v51 = vmul.f32 %v388_v43, %v382_v45 }
  0x74   :  { %v340_v29 = vpop.permute.xlu0 %339 }
  0x75   :  { %v335_v28 = vpop.permute.xlu1 %334  ;;  %v344_v42 = vmul.f32 %v342_v33, %v340_v29  ;;  %v392_v57 = vadd.f32 %v391_v52, %v389_v51 }
  0x76   :  { %v343_v40 = vmul.f32 %v342_v33, %v335_v28 }
  0x77   :  { %v347_v47 = vadd.f32 %v345_v41, %v344_v42 }
  0x78   :  { %v346_v34 = vadd.f32 %v345_v41, %v343_v40 }
  0x7d   :  { %v354_v37 = vpop.permute.xlu0 %353 }
  0x7e   :  { %v350_v35 = vpop.permute.xlu1 %349  ;;  %v358_v2 = vmul.f32 %v356_v32, %v354_v37 }
  0x7f   :  { %v357_v38 = vmul.f32 %v356_v32, %v350_v35 }
  0x80   :  { %v361_v16 = vadd.f32 %v359_v36, %v358_v2 }
  0x81   :  { %v360_v3 = vadd.f32 %v359_v36, %v357_v38 }
  0x82   :  { %v363_v50 = vmul.f32 %v361_v16, %v347_v47 }
  0x83   :  { %v362_v49 = vmul.f32 %v360_v3, %v346_v34 }
  0x84   :  { %v379_v59 = vmul.f32 %v377_v54, %v363_v50 }
  0x85   :  { %v378_v60 = vmul.f32 %v376_v55, %v362_v49 }
  0x87   :  { %v386_v53 = vpop.permute.xlu1 %385  ;;  %v394_v62 = vmul.f32 %v392_v57, %v378_v60 }
  0x88   :  { %v390_v56 = vmul.f32 %v388_v43, %v386_v53 }
  0x8a   :  { %v393_v58 = vadd.f32 %v391_v52, %v390_v56 }
  0x8c   :  { %v395_v61 = vmul.f32 %v393_v58, %v379_v59 }
  0x8e   :  { %427 = vmatpush.msra.mxu0 %v395_v61  ;;  %499 = vmatpush.msra.mxu2 %v395_v61 }
  0x8f   :  { %500 = vmatpush.msra.mxu3 %v395_v61 }
  0x90   :  { %428 = vmatpush.msra.mxu0 %v394_v62  ;;  %501 = vmatpush.msra.mxu2 %v394_v62 }
  0x91   :  { %502 = vmatpush.msra.mxu3 %v394_v62  ;;  %495 = vmatmul.msk.f32.vlgmr.msra.gmra.mxu2 %vm400_vm5, %v397_v63 }
  0x92   :  { %497 = vmatmul.msk.f32.vlgmr.msra.gmra.mxu3 %vm400_vm5, %v399_v0  ;;  %494 = vmatmul.msk.f32.vlgmr.msra.gmra.mxu0 %vm400_vm5, %v396_v1 }
  0x99   :  { %496 = vmatmul.msk.f32.gmra.mxu2 %vm400_vm5, %v398_v4 }
 0x10f   :  { %v430_v9 = vpop.f32.mrf.mxu0 }
 0x110   :  { %v443_v12 = vmul.f32 %v430_v9, %v430_v9 }
 0x114   :  { %v433_v5 = vpop.f32.mrf.mxu2 }
 0x115   :  { %v439_v8 = vpop.f32.mrf.mxu3  ;;  %v444_v11 = vmul.f32 %v433_v5, %v433_v5 }
 0x116   :  { %v446_v6 = vmul.f32 %v439_v8, %v439_v8 }
 0x118   :  { %463 = vmatpush.msra.mxu1 %v446_v6 }
 0x11c   :  { %v436_v7 = vpop.f32.mrf.mxu2 }
 0x11d   :  { %v445_v10 = vmul.f32 %v436_v7, %v436_v7 }
 0x11f   :  { %464 = vmatpush.msra.mxu1 %v445_v10 }
 0x121   :  { %465 = vmatpush.msra.mxu1 %v444_v11 }
 0x123   :  { %466 = vmatpush.msra.mxu1 %v443_v12 }
 0x124   :  { %498 = vmatmul.msk.f32.vlgmr.msra.gmra.mxu1 %vm447_vm6, %v442_v13 }
 0x1a1   :  { %v468_v14 = vpop.f32.mrf.mxu1 }
 0x1a2   :  { %471 = vst [vmem:[#allocation2] sm:$0xf] %v468_v14 }
 0x1a3   :  { %482 = dma.vmem_to_hbm [thread:$0]  %s478_s29, 64, %s480_s6, [#allocation3]  }
 0x1a4   :  { %546 = dma.done.wait [#allocation3], 64  }
 0x1a5   :  { %547 = vsyncadd [#allocation3], 4294967232 }
 0x1a6   :  { %487 = vsyncpa [#allocation3], 1 }

</bundles_post_ra>
